<compile_context>
chip_gen: v6e
topology: v6e:2x2x1
jax: 0.10.0
libtpu: 0.0.40
codegen_flags: <defaults>
</compile_context>

<pallas_src>
import jax
import jax.numpy as jnp
from jax import lax
from jax.experimental import pallas as pl
from jax.experimental.pallas import tpu as pltpu


def _round_up(x, m):
    return ((x + m - 1) // m) * m


def _largest_divisor_within(b, per_item_bytes, budget_bytes):
    """Largest divisor of b such that divisor * per_item_bytes <= budget (min 1)."""
    best = 1
    d = 1
    while d * d <= b:
        if b % d == 0:
            for cand in (d, b // d):
                if cand > best and cand * per_item_bytes <= budget_bytes:
                    best = cand
        d += 1
    return best


def _masked_bce_kernel(pred_ref, label_ref, vm_ref, sm_ref, out_ref):
    # Blocks: pred/label (TB, N, M) native dtype; vm (TB, 1, N) f32 with the
    # pairwise mask folded in; sm (TB, 1, M) f32; out (1, 1, M) f32 partial sum
    # of the NEGATED masked BCE (the wrapper negates the scalar once).
    tb, n, m = pred_ref.shape

    def body(i, acc):
        p = pred_ref[i].astype(jnp.float32)                # (N, M), widened in VMEM
        lbl = label_ref[i].astype(jnp.float32)             # (N, M)
        # nn.BCELoss semantics: log terms clamped at -100 (EUP logs, VPU max).
        log_p = jnp.maximum(jnp.log(p), -100.0)
        log_1mp = jnp.maximum(jnp.log(1.0 - p), -100.0)
        # Negated BCE:  l*log_p + (1-l)*log_1mp == log_1mp + l*(log_p - log_1mp)
        neg_loss = log_1mp + lbl * (log_p - log_1mp)       # (N, M)
        # Vertex-mask-weighted reduction over N on the (otherwise idle) MXU;
        # keeps the lane (M) axis intact.  Exact f32 via HIGHEST precision.
        red = jnp.dot(vm_ref[i], neg_loss,
                      preferred_element_type=jnp.float32,
                      precision=lax.Precision.HIGHEST)     # (1, N) @ (N, M) -> (1, M)
        # seq_mask factored out of the per-element product: applied once per row.
        return acc + red * sm_ref[i]                       # (1, M)

    # Unroll only thin bodies (keeps f32 temporaries bounded when N*M is large).
    unroll = min(tb, 8) if (n * m * 4) <= (64 << 10) else 1
    acc = lax.fori_loop(0, tb, body, jnp.zeros((1, m), jnp.float32), unroll=unroll)
    out_ref[...] = acc[None]                               # (1, 1, M)


def masked_bce_loss(pred, label, pairwise_mask, vertex_mask, seq_mask):
    """pred, label: (B, N, M); pairwise_mask: (B,); vertex_mask: (B, N); seq_mask: (B, M)."""
    B, N, M = pred.shape
    itemsize = jnp.dtype(pred.dtype).itemsize

    pmask_f = pairwise_mask.astype(jnp.float32)                                  # (B,)
    # Fold the per-batch pairwise mask into the vertex mask (the mask factorizes).
    vm = (vertex_mask.astype(jnp.float32) * pmask_f[:, None])[:, None, :]        # (B, 1, N)
    sm = seq_mask.astype(jnp.float32)[:, None, :]                                # (B, 1, M)

    # Per-batch VMEM footprint of one buffer set: pred + label (native dtype)
    # plus the lane-padded (1, N) / (1, M) mask rows (each pads to (8, r128(.))).
    per_batch = (2 * N * M * itemsize
                 + 8 * _round_up(N, 128) * 4
                 + 8 * _round_up(M, 128) * 4)
    # Double-buffered input footprint <= 16 MiB (~4 MiB per input block):
    # big enough to sit near HBM roofline on v5e/v6e, bounded for v7x's 64 MiB VMEM.
    TB = _largest_divisor_within(B, 2 * per_batch, 16 << 20)
    G = B // TB
    # TODO(synk): for extremely large single-batch N*M (> ~1.5M f32 elements) add a
    # second grid axis over N chunks so one batch's block + temporaries fit VMEM.

    total = B * N * M
    cost = pl.CostEstimate(
        flops=11 * total,
        transcendentals=2 * total,
        bytes_accessed=int(2 * total * itemsize + (vm.size + sm.size) * 4 + G * M * 4),
    )

    partials = pl.pallas_call(
        _masked_bce_kernel,
        out_shape=jax.ShapeDtypeStruct((G, 1, M), jnp.float32),
        grid_spec=pltpu.PrefetchScalarGridSpec(
            num_scalar_prefetch=0,
            grid=(G,),
            in_specs=[
                pl.BlockSpec((TB, N, M), lambda g: (g, 0, 0)),   # pred  (native dtype, unpadded)
                pl.BlockSpec((TB, N, M), lambda g: (g, 0, 0)),   # label (native dtype, unpadded)
                pl.BlockSpec((TB, 1, N), lambda g: (g, 0, 0)),   # vertex_mask * pairwise_mask
                pl.BlockSpec((TB, 1, M), lambda g: (g, 0, 0)),   # seq_mask
            ],
            out_specs=pl.BlockSpec((1, 1, M), lambda g: (g, 0, 0)),
        ),
        compiler_params=pltpu.CompilerParams(
            dimension_semantics=("parallel",),        # independent partials per step
            vmem_limit_bytes=48 * 1024 * 1024,        # big blocks on v5e/v6e, safe on v7x
        ),
        cost_estimate=cost,
    )(pred, label, vm, sm)

    numerator = -jnp.sum(partials)                    # kernel accumulates the negated BCE
    denominator = jnp.maximum(jnp.sum(pmask_f), 1e-10)
    return numerator / denominator


def _reference(pred, label, pairwise_mask, vertex_mask, seq_mask):
    pred = pred.astype(jnp.float32)
    label = label.astype(jnp.float32)
    loss_all = -(label * jnp.maximum(jnp.log(pred), -100.0)
                 + (1.0 - label) * jnp.maximum(jnp.log(1.0 - pred), -100.0))
    mask = (vertex_mask.astype(jnp.float32)[:, :, None]
            * seq_mask.astype(jnp.float32)[:, None, :]
            * pairwise_mask.astype(jnp.float32)[:, None, None])
    return jnp.sum(loss_all * mask) / jnp.clip(jnp.sum(pairwise_mask.astype(jnp.float32)), 1e-10)


if __name__ == "__main__":
    base = jax.random.PRNGKey(0)

    def run_case(B, N, M, dtype, rtol, atol):
        k1, k2, k3, k4, k5 = jax.random.split(jax.random.fold_in(base, B * 10000 + N * 100 + M), 5)
        pred = jax.nn.sigmoid(jax.random.normal(k1, (B, N, M), dtype=jnp.float32)).astype(dtype)
        label = (jax.random.uniform(k2, (B, N, M)) > 0.5).astype(dtype)
        vertex_mask = (jax.random.uniform(k3, (B, N)) > 0.3).astype(jnp.float32)
        seq_mask = (jax.random.uniform(k4, (B, M)) > 0.3).astype(jnp.float32)
        pairwise_mask = (jax.random.uniform(k5, (B,)) > 0.2).astype(jnp.float32)

        loss = masked_bce_loss(pred, label, pairwise_mask, vertex_mask, seq_mask)
        jax.block_until_ready(loss)
        ref = _reference(pred, label, pairwise_mask, vertex_mask, seq_mask)
        assert jnp.allclose(loss, ref, rtol=rtol, atol=atol), (B, N, M, dtype, loss, ref)

    # f32 path, batch-blocked (TB = B).
    run_case(2, 8, 32, jnp.float32, rtol=1e-4, atol=1e-5)
    # Non-(8,128)-aligned N and M, no padding anywhere (unaligned dot / masked store path).
    run_case(3, 7, 63, jnp.float32, rtol=1e-4, atol=1e-5)
    # bf16 activations: native dtype travels into the kernel, widened in VMEM.
    run_case(2, 8, 32, jnp.bfloat16, rtol=1e-4, atol=1e-4)

    print("KERNEL_OK")
</pallas_src>

<mosaic_0001>
module attributes {stable_mosaic.version = 11 : i64} {
  func.func @_masked_bce_kernel(%arg0: i32, %arg1: memref<2x8x32xf32, #tpu.memory_space<vmem>>, %arg2: memref<2x8x32xf32, #tpu.memory_space<vmem>>, %arg3: memref<2x1x8xf32, #tpu.memory_space<vmem>>, %arg4: memref<2x1x32xf32, #tpu.memory_space<vmem>>, %arg5: memref<1x1x32xf32, #tpu.memory_space<vmem>>) attributes {dimension_semantics = [#tpu.dimension_semantics<parallel>], iteration_bounds = array<i64: 1>, scalar_prefetch = 0 : i64, scratch_operands = 0 : i64, tpu.core_type = #tpu.core_type<tc>, window_params = [{transform_indices = @transform_0, window_bounds = array<i64: 2, 8, 32>}, {transform_indices = @transform_1, window_bounds = array<i64: 2, 8, 32>}, {transform_indices = @transform_2, window_bounds = array<i64: 2, 1, 8>}, {transform_indices = @transform_3, window_bounds = array<i64: 2, 1, 32>}, {transform_indices = @transform_4, window_bounds = array<i64: 1, 1, 32>}]} {
    %cst = arith.constant 0.000000e+00 : f32
    %0 = vector.broadcast %cst : f32 to vector<1x32xf32>
    %c0_i32 = arith.constant 0 : i32
    %1 = arith.index_cast %c0_i32 : i32 to index
    %c0 = arith.constant 0 : index
    %c0_0 = arith.constant 0 : index
    %2 = vector.load %arg1[%1, %c0, %c0_0] : memref<2x8x32xf32, #tpu.memory_space<vmem>>, vector<1x8x32xf32>
    %3 = vector.shape_cast %2 : vector<1x8x32xf32> to vector<8x32xf32>
    %4 = arith.index_cast %c0_i32 : i32 to index
    %c0_1 = arith.constant 0 : index
    %c0_2 = arith.constant 0 : index
    %5 = vector.load %arg2[%4, %c0_1, %c0_2] : memref<2x8x32xf32, #tpu.memory_space<vmem>>, vector<1x8x32xf32>
    %6 = vector.shape_cast %5 : vector<1x8x32xf32> to vector<8x32xf32>
    %7 = math.log %3 : vector<8x32xf32>
    %cst_3 = arith.constant -1.000000e+02 : f32
    %8 = vector.broadcast %cst_3 : f32 to vector<8x32xf32>
    %9 = arith.maximumf %7, %8 : vector<8x32xf32>
    %cst_4 = arith.constant 1.000000e+00 : f32
    %10 = vector.broadcast %cst_4 : f32 to vector<8x32xf32>
    %11 = arith.subf %10, %3 : vector<8x32xf32>
    %12 = math.log %11 : vector<8x32xf32>
    %cst_5 = arith.constant -1.000000e+02 : f32
    %13 = vector.broadcast %cst_5 : f32 to vector<8x32xf32>
    %14 = arith.maximumf %12, %13 : vector<8x32xf32>
    %15 = arith.subf %9, %14 : vector<8x32xf32>
    %16 = arith.mulf %6, %15 : vector<8x32xf32>
    %17 = arith.addf %14, %16 : vector<8x32xf32>
    %18 = arith.index_cast %c0_i32 : i32 to index
    %c0_6 = arith.constant 0 : index
    %c0_7 = arith.constant 0 : index
    %19 = vector.load %arg3[%18, %c0_6, %c0_7] : memref<2x1x8xf32, #tpu.memory_space<vmem>>, vector<1x1x8xf32>
    %20 = vector.shape_cast %19 : vector<1x1x8xf32> to vector<1x8xf32>
    %cst_8 = arith.constant dense<0.000000e+00> : vector<1x32xf32>
    %21 = tpu.matmul %20, %17, %cst_8 {dimension_numbers = #tpu.dot_dimension_numbers<[1], [0], [0], [1], [0, 0, 1, 1], [], []>, precision = #tpu.contract_precision<fp32>} : vector<1x8xf32>, vector<8x32xf32>, vector<1x32xf32> -> vector<1x32xf32>
    %22 = arith.index_cast %c0_i32 : i32 to index
    %c0_9 = arith.constant 0 : index
    %c0_10 = arith.constant 0 : index
    %23 = vector.load %arg4[%22, %c0_9, %c0_10] : memref<2x1x32xf32, #tpu.memory_space<vmem>>, vector<1x1x32xf32>
    %24 = vector.shape_cast %23 : vector<1x1x32xf32> to vector<1x32xf32>
    %25 = arith.mulf %21, %24 : vector<1x32xf32>
    %26 = arith.addf %0, %25 : vector<1x32xf32>
    %c1_i32 = arith.constant 1 : i32
    %27 = arith.index_cast %c1_i32 : i32 to index
    %c0_11 = arith.constant 0 : index
    %c0_12 = arith.constant 0 : index
    %28 = vector.load %arg1[%27, %c0_11, %c0_12] : memref<2x8x32xf32, #tpu.memory_space<vmem>>, vector<1x8x32xf32>
    %29 = vector.shape_cast %28 : vector<1x8x32xf32> to vector<8x32xf32>
    %30 = arith.index_cast %c1_i32 : i32 to index
    %c0_13 = arith.constant 0 : index
    %c0_14 = arith.constant 0 : index
    %31 = vector.load %arg2[%30, %c0_13, %c0_14] : memref<2x8x32xf32, #tpu.memory_space<vmem>>, vector<1x8x32xf32>
    %32 = vector.shape_cast %31 : vector<1x8x32xf32> to vector<8x32xf32>
    %33 = math.log %29 : vector<8x32xf32>
    %cst_15 = arith.constant -1.000000e+02 : f32
    %34 = vector.broadcast %cst_15 : f32 to vector<8x32xf32>
    %35 = arith.maximumf %33, %34 : vector<8x32xf32>
    %cst_16 = arith.constant 1.000000e+00 : f32
    %36 = vector.broadcast %cst_16 : f32 to vector<8x32xf32>
    %37 = arith.subf %36, %29 : vector<8x32xf32>
    %38 = math.log %37 : vector<8x32xf32>
    %cst_17 = arith.constant -1.000000e+02 : f32
    %39 = vector.broadcast %cst_17 : f32 to vector<8x32xf32>
    %40 = arith.maximumf %38, %39 : vector<8x32xf32>
    %41 = arith.subf %35, %40 : vector<8x32xf32>
    %42 = arith.mulf %32, %41 : vector<8x32xf32>
    %43 = arith.addf %40, %42 : vector<8x32xf32>
    %44 = arith.index_cast %c1_i32 : i32 to index
    %c0_18 = arith.constant 0 : index
    %c0_19 = arith.constant 0 : index
    %45 = vector.load %arg3[%44, %c0_18, %c0_19] : memref<2x1x8xf32, #tpu.memory_space<vmem>>, vector<1x1x8xf32>
    %46 = vector.shape_cast %45 : vector<1x1x8xf32> to vector<1x8xf32>
    %cst_20 = arith.constant dense<0.000000e+00> : vector<1x32xf32>
    %47 = tpu.matmul %46, %43, %cst_20 {dimension_numbers = #tpu.dot_dimension_numbers<[1], [0], [0], [1], [0, 0, 1, 1], [], []>, precision = #tpu.contract_precision<fp32>} : vector<1x8xf32>, vector<8x32xf32>, vector<1x32xf32> -> vector<1x32xf32>
    %48 = arith.index_cast %c1_i32 : i32 to index
    %c0_21 = arith.constant 0 : index
    %c0_22 = arith.constant 0 : index
    %49 = vector.load %arg4[%48, %c0_21, %c0_22] : memref<2x1x32xf32, #tpu.memory_space<vmem>>, vector<1x1x32xf32>
    %50 = vector.shape_cast %49 : vector<1x1x32xf32> to vector<1x32xf32>
    %51 = arith.mulf %47, %50 : vector<1x32xf32>
    %52 = arith.addf %26, %51 : vector<1x32xf32>
    %c2_i32 = arith.constant 2 : i32
    %53 = vector.shape_cast %52 : vector<1x32xf32> to vector<1x1x32xf32>
    %c0_23 = arith.constant 0 : index
    %c0_24 = arith.constant 0 : index
    %c0_25 = arith.constant 0 : index
    %54 = vector.load %arg5[%c0_23, %c0_24, %c0_25] : memref<1x1x32xf32, #tpu.memory_space<vmem>>, vector<1x1x32xf32>
    tpu.vector_store %arg5[%c0_23, %c0_24, %c0_25], %53 {strides = array<i32>} : memref<1x1x32xf32, #tpu.memory_space<vmem>>, vector<1x1x32xf32>,
    return
  }
  func.func @transform_0(%arg0: i32) -> (i32, i32, i32) {
    %c0_i32 = arith.constant 0 : i32
    %c0_i32_0 = arith.constant 0 : i32
    %c0_i32_1 = arith.constant 0 : i32
    return %arg0, %c0_i32, %c0_i32_0 : i32, i32, i32
  }
  func.func @transform_1(%arg0: i32) -> (i32, i32, i32) {
    %c0_i32 = arith.constant 0 : i32
    %c0_i32_0 = arith.constant 0 : i32
    %c0_i32_1 = arith.constant 0 : i32
    return %arg0, %c0_i32, %c0_i32_0 : i32, i32, i32
  }
  func.func @transform_2(%arg0: i32) -> (i32, i32, i32) {
    %c0_i32 = arith.constant 0 : i32
    %c0_i32_0 = arith.constant 0 : i32
    %c0_i32_1 = arith.constant 0 : i32
    return %arg0, %c0_i32, %c0_i32_0 : i32, i32, i32
  }
  func.func @transform_3(%arg0: i32) -> (i32, i32, i32) {
    %c0_i32 = arith.constant 0 : i32
    %c0_i32_0 = arith.constant 0 : i32
    %c0_i32_1 = arith.constant 0 : i32
    return %arg0, %c0_i32, %c0_i32_0 : i32, i32, i32
  }
  func.func @transform_4(%arg0: i32) -> (i32, i32, i32) {
    %c0_i32 = arith.constant 0 : i32
    %c0_i32_0 = arith.constant 0 : i32
    %c0_i32_1 = arith.constant 0 : i32
    return %arg0, %c0_i32, %c0_i32_0 : i32, i32, i32
  }
}

</mosaic_0001>

<bundles_post_ra>
// kernel: tpu_custom_call.1
= control target key start
LH: loop header
LB: loop body
LE: loop exit
PB: predicated region body
PF: predicated region fallthrough
CT: control target
= control target key end

     0   :  { %9 = vsyncpa [#allocation3], 0  ;;  %s1263_s0 = inlined_call_operand.hbm [shape: f32[2,8,32], index: 0, kind: input, shape index: {}]   ;;  %s1264_s1 = inlined_call_operand.hbm [shape: f32[2,8,32], index: 1, kind: input, shape index: {}]   ;;  %s1265_s2 = inlined_call_operand.vmem [shape: f32[2,1,8], index: 2, kind: input, shape index: {}]   ;;  %s1266_s3 = inlined_call_operand.vmem [shape: f32[2,1,32], index: 3, kind: input, shape index: {}]   ;;  %s1267_s4 = inlined_call_operand.hbm [shape: f32[1,1,32], index: 4, kind: output, shape index: {}]  }
   0x1   :  { %10 = vsyncpa [#allocation6], 0 }
   0x2   :  { %11 = vsyncpa [#allocation4], 0  ;;  %s1166_s15 = smov [#allocation2]  }
   0x3   :  { %s17_s16 = sshll.u32 %s1166_s15, 4  ;;  %s18_s16 = int_to_ptr.vmem [resolvable:$true] %s17_s16 }
   0x4   :  { %s1108_s17 = scalar_lea.vmem %s18_s16, 256  ;;  %p1113_p1 = scmp.lt.s32.totalorder %s18_s16, %s18_s16 }
   0x5   :  { %p1109_p0 = scmp.ne.s32.totalorder %s18_s16, %s1108_s17  ;;  %p1114_p2 = scmp.lt.s32.totalorder %s1108_s17, %s1108_s17 }
   0x7   :  { %p1115_p3 = por %p1114_p2, %p1113_p1 }
   0x9   :  { %p1116_p4 = pnand %p1115_p3, %p1109_p0 }
   0xb   :  { %1119 = shalt.err (!%p1116_p4)
}
   0xc   :  { %s1167_s18 = smov 128   ;;  %s1168_s19 = smov 8  }
   0xd   :  { %23 = dma.hbm_to_vmem [thread:$0]  %s1263_s0, 256, %s18_s16, [#allocation3], %s1167_s18, %s1167_s18, %s1168_s19  }
   0xe   :  { %s1169_s22 = smov [#allocation5]  }
   0xf   :  { %s29_s23 = sshll.u32 %s1169_s22, 4  ;;  %s30_s23 = int_to_ptr.vmem [resolvable:$true] %s29_s23 }
  0x10   :  { %s1128_s24 = scalar_lea.vmem %s30_s23, 256  ;;  %p1133_p6 = scmp.lt.s32.totalorder %s30_s23, %s30_s23 }
  0x11   :  { %p1129_p5 = scmp.ne.s32.totalorder %s30_s23, %s1128_s24  ;;  %p1134_p7 = scmp.lt.s32.totalorder %s1128_s24, %s1128_s24 }
  0x13   :  { %p1135_p8 = por %p1134_p7, %p1133_p6 }
  0x15   :  { %p1136_p9 = pnand %p1135_p8, %p1129_p5 }
  0x17   :  { %1139 = shalt.err (!%p1136_p9)
}
  0x18   :  { %35 = dma.hbm_to_vmem [thread:$0]  %s1264_s1, 256, %s30_s23, [#allocation6], %s1167_s18, %s1167_s18, %s1168_s19  }
  0x19   :  { %1160 = dma.done.wait [#allocation3], 256  }
  0x1a   :  { %1161 = vsyncadd [#allocation3], 4294967040 }
  0x1b   :  { %1162 = dma.done.wait [#allocation6], 256  }
  0x1c   :  { %1163 = vsyncadd [#allocation6], 4294967040  ;;  %v1170_v0 = vmov 0.0   ;;  %vm1171_vm0 = vmmov 0   ;;  %v46_v1 = vld [vmem:[#allocation2] sm:$0xff]  ;;  %v513_v3 = vld [vmem:[#allocation2 + $0x8] sm:$0xff] }
  0x1d   :  { %1025 = vmatprep.subr.mxu0 %v1170_v0  ;;  %1027 = vmatprep.mubr.msk.f32.mxu0 %vm1171_vm0, %v1170_v0  ;;  %1092 = vlog2.f32 %v46_v1  ;;  %v51_v2 = vsub.f32 1.0, %v46_v1  ;;  %v519_v4 = vsub.f32 1.0, %v513_v3  ;;  %v58_v5 = vld [vmem:[%s1265_s2] sm:$0x1]  ;;  %vm59_vm1 = vcmask 64512   ;;  %v47_v22 = vld [vmem:[#allocation5] sm:$0xff] }
  0x1e   :  { %1030 = vmatprep.subr.mxu1 %v1170_v0  ;;  %1032 = vmatprep.mubr.msk.f32.mxu1 %vm1171_vm0, %v1170_v0  ;;  %1094 = vlog2.f32 %v513_v3  ;;  %v61_v6 = vsel %vm59_vm1, %v58_v5, 0  ;;  %v999_v18 = vld [vmem:[%s1265_s2 + $0x1] sm:$0x1]  ;;  %v515_v26 = vld [vmem:[#allocation5 + $0x8] sm:$0xff]  ;;  %s1172_s6 = smov [#allocation7]   ;;  %vm981_vm2 = vcmask 253952  }
  0x1f   :  { %1096 = vlog2.f32 %v51_v2  ;;  %v1214_v7 = vand.u32 4294901760, %v61_v6  ;;  %v529_v25 = vsel %vm59_vm1, %v999_v18, 0  ;;  %v1000_v18 = vld [vmem:[%s1266_s3 + $0x1] sm:$0x1]  ;;  %s989_s7 = sshll.u32 %s1172_s6, 4  ;;  %s990_s7 = int_to_ptr.vmem [resolvable:$true] %s989_s7 }
  0x20   :  { %1098 = vlog2.f32 %v519_v4  ;;  %v597_v30 = vand.u32 4294901760, %v529_v25  ;;  %s1140_s8 = scalar_lea.vmem %s990_s7, 16  ;;  %s1144_s9 = scalar_lea.vmem %s990_s7, 32 }
  0x21   :  { %v130_v9 = vsub.f32 %v61_v6, %v1214_v7  ;;  %p1141_p10 = scmp.ne.s32.totalorder %s990_s7, %s1140_s8  ;;  %p1145_p11 = scmp.lt.s32.totalorder %s990_s7, %s990_s7 }
  0x22   :  { %v598_v37 = vsub.f32 %v529_v25, %v597_v30  ;;  %p1146_p12 = scmp.lt.s32.totalorder %s1144_s9, %s1140_s8 }
  0x23   :  { %v131_v17 = vand.u32 4294901760, %v130_v9 }
  0x24   :  { %v599_v41 = vand.u32 4294901760, %v598_v37  ;;  %p1147_p13 = por %p1146_p12, %p1145_p11 }
  0x25   :  { %v132_v27 = vsub.f32 %v130_v9, %v131_v17 }
  0x26   :  { %v600_v45 = vsub.f32 %v598_v37, %v599_v41  ;;  %p1148_p0 = pnand %p1147_p13, %p1141_p10 }
  0x27   :  { %v133_v33 = vand.u32 4294901760, %v132_v27 }
  0x28   :  { %v601_v47 = vand.u32 4294901760, %v600_v45 }
  0x2a   :  { %v1093_v8 = vpop.eup %1092 }
  0x2b   :  { %v1095_v10 = vpop.eup %1094  ;;  %v49_v11 = vmul.f32 0.6931472, %v1093_v8 }
  0x2c   :  { %v1097_v12 = vpop.eup %1096  ;;  %v517_v13 = vmul.f32 0.6931472, %v1095_v10 }
  0x2d   :  { %v1099_v14 = vpop.eup %1098  ;;  %v50_v15 = vmax.f32 %v49_v11, -100.0  ;;  %v53_v16 = vmul.f32 0.6931472, %v1097_v12 }
  0x2e   :  { %v518_v19 = vmax.f32 %v517_v13, -100.0  ;;  %v521_v20 = vmul.f32 0.6931472, %v1099_v14 }
  0x2f   :  { %v54_v21 = vmax.f32 %v53_v16, -100.0  ;;  %v509_v16 = vld [vmem:[%s1266_s3] sm:$0x1] }
  0x30   :  { %v522_v23 = vmax.f32 %v521_v20, -100.0 }
  0x31   :  { %v55_v24 = vsub.f32 %v50_v15, %v54_v21 }
  0x32   :  { %v523_v28 = vsub.f32 %v518_v19, %v522_v23 }
  0x33   :  { %v56_v29 = vmul.f32 %v55_v24, %v47_v22 }
  0x34   :  { %v524_v31 = vmul.f32 %v523_v28, %v515_v26 }
  0x35   :  { %v57_v32 = vadd.f32 %v56_v29, %v54_v21 }
  0x36   :  { %v525_v34 = vadd.f32 %v524_v31, %v522_v23 }
  0x37   :  { %v94_v35 = vand.u32 4294901760, %v57_v32 }
  0x38   :  { %v562_v36 = vand.u32 4294901760, %v525_v34 }
  0x39   :  { %1026 = vmatpush3.msra.mxu0 %v94_v35  ;;  %v171_v38 = vsub.f32 %v57_v32, %v94_v35 }
  0x3a   :  { %1028 = vmatmul.mubr.f32.vlgmr.msra.gmra.mxu0 %v133_v33  ;;  %1035 = vmatprep.subr.mxu0 %v1170_v0  ;;  %v639_v40 = vsub.f32 %v525_v34, %v562_v36 }
  0x3b   :  { %v172_v39 = vand.u32 4294901760, %v171_v38  ;;  %1036 = vmatpush3.msra.mxu0 %v171_v38  ;;  %1037 = vmatprep.mubr.msk.f32.mxu0 %vm1171_vm0, %v1170_v0 }
  0x3c   :  { %1045 = vmatprep.subr.mxu0 %v1170_v0  ;;  %v640_v44 = vand.u32 4294901760, %v639_v40 }
  0x3d   :  { %v173_v42 = vsub.f32 %v171_v38, %v172_v39 }
  0x3e   :  { %1038 = vmatmul.mubr.f32.vlgmr.msra.gmra.mxu0 %v130_v9  ;;  %v641_v46 = vsub.f32 %v639_v40, %v640_v44 }
  0x3f   :  { %v174_v43 = vand.u32 4294901760, %v173_v42  ;;  %1046 = vmatpush3.msra.mxu0 %v172_v39  ;;  %1047 = vmatprep.mubr.msk.f32.mxu0 %vm1171_vm0, %v1170_v0 }
  0x40   :  { %1055 = vmatprep.subr.mxu0 %v1170_v0  ;;  %v642_v48 = vand.u32 4294901760, %v641_v46 }
  0x41   :  { %1031 = vmatpush3.msra.mxu1 %v174_v43 }
  0x42   :  { %1033 = vmatmul.mubr.f32.vlgmr.msra.gmra.mxu1 %v1214_v7  ;;  %1040 = vmatprep.subr.mxu1 %v1170_v0 }
  0x43   :  { %1041 = vmatpush3.msra.mxu1 %v94_v35  ;;  %1042 = vmatprep.mubr.msk.f32.mxu1 %vm1171_vm0, %v1170_v0 }
  0x44   :  { %1050 = vmatprep.subr.mxu1 %v1170_v0  ;;  %1048 = vmatmul.mubr.f32.vlgmr.msra.gmra.mxu0 %v1214_v7 }
  0x45   :  { %1056 = vmatpush3.msra.mxu0 %v562_v36  ;;  %1057 = vmatprep.mubr.msk.f32.mxu0 %vm1171_vm0, %v1170_v0 }
  0x46   :  { %1043 = vmatmul.mubr.f32.vlgmr.msra.gmra.mxu1 %v131_v17  ;;  %1065 = vmatprep.subr.mxu0 %v1170_v0 }
  0x47   :  { %1051 = vmatpush3.msra.mxu1 %v94_v35  ;;  %1052 = vmatprep.mubr.msk.f32.mxu1 %vm1171_vm0, %v1170_v0 }
  0x48   :  { %1060 = vmatprep.subr.mxu1 %v1170_v0  ;;  %1058 = vmatmul.mubr.f32.vlgmr.msra.gmra.mxu0 %v601_v47 }
  0x49   :  { %1066 = vmatpush3.msra.mxu0 %v639_v40  ;;  %1067 = vmatprep.mubr.msk.f32.mxu0 %vm1171_vm0, %v1170_v0 }
  0x4a   :  { %1053 = vmatmul.mubr.f32.vlgmr.msra.gmra.mxu1 %v1214_v7  ;;  %1075 = vmatprep.subr.mxu0 %v1170_v0 }
  0x4b   :  { %1061 = vmatpush3.msra.mxu1 %v642_v48  ;;  %1062 = vmatprep.mubr.msk.f32.mxu1 %vm1171_vm0, %v1170_v0 }
  0x4c   :  { %1070 = vmatprep.subr.mxu1 %v1170_v0  ;;  %1068 = vmatmul.mubr.f32.vlgmr.msra.gmra.mxu0 %v598_v37 }
  0x4d   :  { %1076 = vmatpush3.msra.mxu0 %v640_v44  ;;  %1077 = vmatprep.mubr.msk.f32.mxu0 %vm1171_vm0, %v1170_v0 }
  0x4e   :  { %1063 = vmatmul.mubr.f32.vlgmr.msra.gmra.mxu1 %v597_v30 }
  0x4f   :  { %1071 = vmatpush3.msra.mxu1 %v562_v36  ;;  %1072 = vmatprep.mubr.msk.f32.mxu1 %vm1171_vm0, %v1170_v0 }
  0x50   :  { %1080 = vmatprep.subr.mxu1 %v1170_v0  ;;  %1078 = vmatmul.mubr.f32.vlgmr.msra.gmra.mxu0 %v597_v30 }
  0x52   :  { %1073 = vmatmul.mubr.f32.vlgmr.msra.gmra.mxu1 %v599_v41 }
  0x53   :  { %1081 = vmatpush3.msra.mxu1 %v562_v36  ;;  %1082 = vmatprep.mubr.msk.f32.mxu1 %vm1171_vm0, %v1170_v0 }
  0x56   :  { %1083 = vmatmul.mubr.f32.vlgmr.msra.gmra.mxu1 %v597_v30 }
  0xfa   :  { %v135_v49 = vpop.f32.mrf.mxu0 }
  0xfc   :  { %v1029_v50 = vpop.f32.mrf.mxu0 }
  0xfe   :  { %v285_v51 = vpop.f32.mrf.mxu0 }
 0x100   :  { %v1039_v52 = vpop.f32.mrf.mxu0 }
 0x102   :  { %v211_v53 = vpop.f32.mrf.mxu1 }
 0x103   :  { %v212_v56 = vadd.f32 %v211_v53, %v135_v49 }
 0x104   :  { %v1034_v54 = vpop.f32.mrf.mxu1  ;;  %v433_v55 = vpop.f32.mrf.mxu0 }
 0x105   :  { %v286_v61 = vadd.f32 %v285_v51, %v212_v56 }
 0x106   :  { %v359_v57 = vpop.f32.mrf.mxu1  ;;  %v1049_v58 = vpop.f32.mrf.mxu0 }
 0x107   :  { %v360_v3 = vadd.f32 %v359_v57, %v286_v61 }
 0x108   :  { %v1044_v59 = vpop.f32.mrf.mxu1  ;;  %v603_v60 = vpop.f32.mrf.mxu0 }
 0x109   :  { %v434_v8 = vadd.f32 %v433_v55, %v360_v3 }
 0x10a   :  { %v505_v62 = vpop.f32.mrf.mxu1  ;;  %v1059_v63 = vpop.f32.mrf.mxu0 }
 0x10b   :  { %v506_v14 = vadd.f32 %v505_v62, %v434_v8 }
 0x10c   :  { %v1054_v1 = vpop.f32.mrf.mxu1  ;;  %v753_v2 = vpop.f32.mrf.mxu0 }
 0x10d   :  { %v510_v21 = vmul.f32 %v509_v16, %v506_v14 }
 0x10e   :  { %v679_v0 = vpop.f32.mrf.mxu1  ;;  %v1069_v4 = vpop.f32.mrf.mxu0 }
 0x10f   :  { %v680_v5 = vadd.f32 %v679_v0, %v603_v60 }
 0x110   :  { %v1064_v6 = vpop.f32.mrf.mxu1  ;;  %v901_v7 = vpop.f32.mrf.mxu0 }
 0x111   :  { %v754_v9 = vadd.f32 %v753_v2, %v680_v5 }
 0x112   :  { %v827_v10 = vpop.f32.mrf.mxu1  ;;  %v1079_v11 = vpop.f32.mrf.mxu0 }
 0x113   :  { %v828_v12 = vadd.f32 %v827_v10, %v754_v9 }
 0x114   :  { %v1074_v13 = vpop.f32.mrf.mxu1 }
 0x115   :  { %v902_v15 = vadd.f32 %v901_v7, %v828_v12 }
 0x116   :  { %v973_v17 = vpop.f32.mrf.mxu1 }
 0x117   :  { %v974_v19 = vadd.f32 %v973_v17, %v902_v15 }
 0x118   :  { %v1084_v20 = vpop.f32.mrf.mxu1 }
 0x119   :  { %v979_v22 = vmul.f32 %v1000_v18, %v974_v19 }
 0x11b   :  { %v980_v23 = vadd.f32 %v979_v22, %v510_v21 }
 0x11d   :  { %982 = vst.msk [vmem:[#allocation7] sm:$0x1] %vm981_vm2, %v980_v23 }
 0x11e   :  { %1151 = shalt.err (!%p1148_p0)
}
 0x11f   :  { %992 = dma.vmem_to_hbm [thread:$0]  %s990_s7, 16, %s1267_s4, [#allocation4]  }
 0x120   :  { %1164 = dma.done.wait [#allocation4], 16  }
 0x121   :  { %1165 = vsyncadd [#allocation4], 4294967280 }
 0x122   :  { %996 = vsyncpa [#allocation3], 1 }
 0x123   :  { %997 = vsyncpa [#allocation6], 1 }
 0x124   :  { %998 = vsyncpa [#allocation4], 1 }

</bundles_post_ra>
